<compile_context>
chip_gen: v6e
topology: v6e:2x2x1
jax: 0.10.0
libtpu: 0.0.40
codegen_flags: <defaults>
</compile_context>

<pallas_src>
import math
import jax
import jax.numpy as jnp
from jax.experimental import pallas as pl
from jax.experimental.pallas import tpu as pltpu


# --------------------------------------------------------------------------------------
# helpers
# --------------------------------------------------------------------------------------

_MAX_TB = 1024   # rows per batch tile (f32); safe on v5e/v6e/v7x scoped-VMEM defaults


def _round_up(x: int, m: int) -> int:
    return ((x + m - 1) // m) * m


def _choose_tiles(B: int, cap: int = _MAX_TB):
    """Pick (TB, Bp): padding bounded by < TB, and >=2 (even) tiles for v7x megacore."""
    nt = -(-B // cap)                      # ceil(B / cap)
    if B >= 256:
        nt = max(nt, 2)                    # keep both v7x TensorCores busy
    if nt > 1 and nt % 2:
        nt += 1                            # even tile count -> balanced across 2 TCs
    TB = _round_up(-(-B // nt), 8)
    Bp = _round_up(B, TB)
    return TB, Bp


def _pad_rows(x, Bp):
    B = x.shape[0]
    return x if B == Bp else jnp.pad(x, ((0, Bp - B), (0, 0)))


def _const_spec(arr):
    """Constant-index BlockSpec: stays VMEM-resident across grid steps."""
    nd = arr.ndim
    return pl.BlockSpec(arr.shape, lambda i, _nd=nd: (0,) * _nd)


def _layer_inputs(layers):
    """Flatten [(W, b), ...] into kernel operands + constant BlockSpecs."""
    flat, specs = [], []
    for (w, b) in layers:
        b2 = b.reshape(1, -1)
        flat += [w, b2]
        specs += [_const_spec(w), _const_spec(b2)]
    return flat, specs


def _block_diag(wa, wc):
    top = jnp.concatenate([wa, jnp.zeros((wa.shape[0], wc.shape[1]), jnp.float32)], axis=1)
    bot = jnp.concatenate([jnp.zeros((wc.shape[0], wa.shape[1]), jnp.float32), wc], axis=1)
    return jnp.concatenate([top, bot], axis=0)


def _build_eval_hidden(actor_params, critic_params):
    """Pre-fused hidden layers for evaluate(): one matmul per layer for actor+critic."""
    L = len(actor_params)
    if L != len(critic_params):
        return None   # unequal depths -> split-loop fallback kernel
    hidden = []
    for l in range(L - 1):
        wa, ba = actor_params[l]
        wc, bc = critic_params[l]
        w = jnp.concatenate([wa, wc], axis=1) if l == 0 else _block_diag(wa, wc)
        hidden.append((w, jnp.concatenate([ba, bc])))
    return hidden


# --------------------------------------------------------------------------------------
# kernels
# --------------------------------------------------------------------------------------

def _make_evaluate_kernel_fused(n_layers, S, A, scale_quad, log_const):
    """Fused actor+critic MLP (block-diag weights) -> Gaussian log_prob + value, packed [TB,2]."""

    def kernel(slab_ref, *refs):
        out_ref = refs[-1]
        w_refs = refs[:-1]

        slab = slab_ref[...]
        x = slab[:, :S]
        act = slab[:, S:S + A]

        h = x
        for l in range(n_layers - 1):                       # fused hidden layers (tanh)
            w = w_refs[2 * l][...]
            b = w_refs[2 * l + 1][...]
            h = jnp.tanh(jnp.dot(h, w, preferred_element_type=jnp.float32) + b)

        wl = w_refs[2 * (n_layers - 1)][...]                # last layer: [mean_i | value_i]
        bl = w_refs[2 * (n_layers - 1) + 1][...]
        z = jnp.dot(h, wl, preferred_element_type=jnp.float32) + bl   # (TB, A+1)

        mean_i = jnp.tanh(z[:, :A])                         # tanh only on actor columns
        value = z[:, A:A + 1]                               # critic column (no tanh)

        diff = act - mean_i
        quad = jnp.sum(diff * diff, axis=1, keepdims=True)  # (TB, 1)
        logp = scale_quad * quad + log_const

        out_ref[...] = jnp.concatenate([logp, value], axis=1)

    return kernel


def _make_evaluate_kernel_split(n_actor, n_critic, agent_idx, S, A, scale_quad, log_const):
    """Fallback for unequal actor/critic depths: two loops, still one pallas_call."""

    def kernel(slab_ref, *refs):
        out_ref = refs[-1]
        actor_refs = refs[:2 * n_actor]
        critic_refs = refs[2 * n_actor:2 * n_actor + 2 * n_critic]

        slab = slab_ref[...]
        x = slab[:, :S]
        act = slab[:, S:S + A]

        h = x
        for l in range(n_actor):
            w = actor_refs[2 * l][...]
            b = actor_refs[2 * l + 1][...]
            h = jnp.tanh(jnp.dot(h, w, preferred_element_type=jnp.float32) + b)
        mean_i = h[:, agent_idx * A:(agent_idx + 1) * A]

        hc = x
        for l in range(n_critic):
            w = critic_refs[2 * l][...]
            b = critic_refs[2 * l + 1][...]
            hc = jnp.dot(hc, w, preferred_element_type=jnp.float32) + b
            if l < n_critic - 1:
                hc = jnp.tanh(hc)
        value = hc[:, agent_idx:agent_idx + 1]

        diff = act - mean_i
        quad = jnp.sum(diff * diff, axis=1, keepdims=True)
        out_ref[...] = jnp.concatenate([scale_quad * quad + log_const, value], axis=1)

    return kernel


def _make_act_kernel(n_actor, S, M, std, log_const):
    """Actor MLP -> reparameterized sample for ALL agents -> per-agent log-prob (segment matmul)."""

    def kernel(slab_ref, seg_ref, *refs):
        action_out = refs[-2]
        logp_out = refs[-1]
        w_refs = refs[:-2]

        slab = slab_ref[...]
        x = slab[:, :S]
        eps = slab[:, S:S + M]

        h = x
        for l in range(n_actor):
            w = w_refs[2 * l][...]
            b = w_refs[2 * l + 1][...]
            h = jnp.tanh(jnp.dot(h, w, preferred_element_type=jnp.float32) + b)
        # h == action_mean, (TB, M)

        action_out[...] = h + eps * std

        # per-agent sum(eps^2) in one MXU segment-sum (MXU idle here; avoids
        # n_agents XLU lane reductions + lane concat).  sum(diff^2)/var == sum(eps^2).
        quad = jnp.dot(eps * eps, seg_ref[...], preferred_element_type=jnp.float32)
        logp_out[...] = -0.5 * quad + log_const

    return kernel


# --------------------------------------------------------------------------------------
# pallas_call wrappers
# --------------------------------------------------------------------------------------

def fused_evaluate(state, action, actor_params, critic_params, agent_idx, action_dim,
                   scale_quad, log_const, fused_hidden=None):
    B, S = state.shape
    A = action.shape[1]
    TB, Bp = _choose_tiles(B)

    slab = jnp.concatenate([state.astype(jnp.float32), action.astype(jnp.float32)], axis=1)
    slab = _pad_rows(slab, Bp)

    if fused_hidden is not None:
        # per-call last fused layer: only agent i's mean columns + its value column
        wa, ba = actor_params[-1]
        wc, bc = critic_params[-1]
        wa_i = wa[:, agent_idx * action_dim:(agent_idx + 1) * action_dim]
        ba_i = ba[agent_idx * action_dim:(agent_idx + 1) * action_dim]
        wc_i = wc[:, agent_idx:agent_idx + 1]
        bc_i = bc[agent_idx:agent_idx + 1]
        if len(actor_params) == 1:
            w_last = jnp.concatenate([wa_i, wc_i], axis=1)      # shared input x
        else:
            w_last = _block_diag(wa_i, wc_i)                    # input is [ha | hc]
        b_last = jnp.concatenate([ba_i, bc_i])
        layers = list(fused_hidden) + [(w_last, b_last)]
        kernel = _make_evaluate_kernel_fused(len(layers), S, A, scale_quad, log_const)
    else:
        layers = list(actor_params) + list(critic_params)
        kernel = _make_evaluate_kernel_split(len(actor_params), len(critic_params),
                                             agent_idx, S, A, scale_quad, log_const)

    flat, specs = _layer_inputs(layers)

    out = pl.pallas_call(
        kernel,
        out_shape=jax.ShapeDtypeStruct((Bp, 2), jnp.float32),
        grid=(Bp // TB,),
        in_specs=[pl.BlockSpec((TB, S + A), lambda i: (i, 0))] + specs,
        out_specs=pl.BlockSpec((TB, 2), lambda i: (i, 0)),
        compiler_params=pltpu.CompilerParams(dimension_semantics=("parallel",)),
    )(slab, *flat)

    out = out[:B]
    return out[:, 0], out[:, 1]          # logp, value_i


def fused_act(state, eps, actor_params, seg, n_agents, action_dim, std, log_const):
    B, S = state.shape
    M = n_agents * action_dim
    TB, Bp = _choose_tiles(B)

    slab = jnp.concatenate([state.astype(jnp.float32), eps.astype(jnp.float32)], axis=1)
    slab = _pad_rows(slab, Bp)

    flat, specs = _layer_inputs(actor_params)

    action_out, logp_out = pl.pallas_call(
        _make_act_kernel(len(actor_params), S, M, std, log_const),
        out_shape=(jax.ShapeDtypeStruct((Bp, M), jnp.float32),
                   jax.ShapeDtypeStruct((Bp, n_agents), jnp.float32)),
        grid=(Bp // TB,),
        in_specs=[pl.BlockSpec((TB, S + M), lambda i: (i, 0)), _const_spec(seg)] + specs,
        out_specs=(pl.BlockSpec((TB, M), lambda i: (i, 0)),
                   pl.BlockSpec((TB, n_agents), lambda i: (i, 0))),
        compiler_params=pltpu.CompilerParams(dimension_semantics=("parallel",)),
    )(slab, seg, *flat)

    return action_out[:B], logp_out[:B]


# --------------------------------------------------------------------------------------
# ActorCritic module (parameters + glue), matching the PyTorch reference semantics
# --------------------------------------------------------------------------------------

class ActorCriticPallas:
    def __init__(self, state_dim, action_dim, n_agents, action_std,
                 actor_layer, critic_layer, key):
        self.state_dim = state_dim
        self.action_dim = action_dim
        self.n_agents = n_agents

        var = float(action_std) * float(action_std)
        self.action_std = float(action_std)
        self.action_var = jnp.full((action_dim,), var, jnp.float32)   # for reference check
        # Gaussian invariants precomputed in glue:
        logdet = action_dim * math.log(var)
        log2pi_d = action_dim * math.log(2.0 * math.pi)
        self.scale_quad = -0.5 / var                       # evaluate: logp = scale*quad + const
        self.log_const = -0.5 * (logdet + log2pi_d)
        self.entropy_const = 0.5 * (logdet + action_dim * (1.0 + math.log(2.0 * math.pi)))

        def init_linear(key, fan_in, fan_out):
            # PyTorch nn.Linear default init: U(-1/sqrt(fan_in), 1/sqrt(fan_in))
            kw, kb = jax.random.split(key)
            bound = 1.0 / math.sqrt(fan_in)
            w = jax.random.uniform(kw, (fan_in, fan_out), jnp.float32, -bound, bound)
            b = jax.random.uniform(kb, (fan_out,), jnp.float32, -bound, bound)
            return w, b

        def init_mlp(key, dims):
            params = []
            for i in range(len(dims) - 1):
                key, sub = jax.random.split(key)
                params.append(init_linear(sub, dims[i], dims[i + 1]))
            return params

        k_actor, k_critic = jax.random.split(key)
        actor_dims = [state_dim] + list(actor_layer) + [action_dim * n_agents]
        critic_dims = [state_dim] + list(critic_layer) + [n_agents]
        self.actor_params = init_mlp(k_actor, actor_dims)
        self.critic_params = init_mlp(k_critic, critic_dims)

        # pre-fused actor+critic hidden layers for evaluate() (None -> split fallback)
        self._eval_hidden = _build_eval_hidden(self.actor_params, self.critic_params)
        # segment-sum matrix for the act() kernel: (M, n_agents), seg[m, j] = [m // A == j]
        M = n_agents * action_dim
        self.seg = (jnp.arange(M)[:, None] // action_dim
                    == jnp.arange(n_agents)[None, :]).astype(jnp.float32)

    def act(self, state, key):
        B = state.shape[0]
        M = self.n_agents * self.action_dim
        eps = jax.random.normal(key, (B, M), jnp.float32)    # one RNG dispatch, all agents
        action_flat, logp = fused_act(
            state, eps, self.actor_params, self.seg, self.n_agents, self.action_dim,
            self.action_std, self.log_const)
        actions = jnp.transpose(action_flat.reshape(B, self.n_agents, self.action_dim),
                                (1, 0, 2))                   # [n_agents, B, A]
        return actions, logp.T                               # [n_agents, B]

    def evaluate(self, state, action, i):
        logp, value = fused_evaluate(
            state, action, self.actor_params, self.critic_params, i, self.action_dim,
            self.scale_quad, self.log_const, fused_hidden=self._eval_hidden)
        # entropy of a fixed diagonal Gaussian is data-independent -> glue broadcast
        entropy = jnp.full_like(logp, self.entropy_const)
        return logp, value, entropy


# --------------------------------------------------------------------------------------
# Pure-JAX reference (for correctness checking)
# --------------------------------------------------------------------------------------

def _ref_mlp(x, params, tanh_last):
    h = x.astype(jnp.float32)
    for l, (w, b) in enumerate(params):
        h = h @ w + b
        if l < len(params) - 1 or tanh_last:
            h = jnp.tanh(h)
    return h


def _ref_evaluate(model, state, action, i):
    am = _ref_mlp(state, model.actor_params, True).reshape(-1, model.n_agents, model.action_dim)
    mean_i = am[:, i, :]
    var = model.action_var
    d = model.action_dim
    diff = action - mean_i
    logp = -0.5 * (jnp.sum(diff * diff / var, axis=1)
                   + jnp.sum(jnp.log(var)) + d * jnp.log(2.0 * jnp.pi))
    ent = 0.5 * (jnp.sum(jnp.log(var)) + d * (1.0 + jnp.log(2.0 * jnp.pi)))
    ent = jnp.broadcast_to(ent, logp.shape)
    sv = _ref_mlp(state, model.critic_params, False)
    return logp, sv[:, i], ent


def _ref_act_logprob(model, state, actions_stacked):
    am = _ref_mlp(state, model.actor_params, True).reshape(-1, model.n_agents, model.action_dim)
    var = model.action_var
    d = model.action_dim
    lps = []
    for j in range(model.n_agents):
        diff = actions_stacked[j] - am[:, j, :]
        lp = -0.5 * (jnp.sum(diff * diff / var, axis=1)
                     + jnp.sum(jnp.log(var)) + d * jnp.log(2.0 * jnp.pi))
        lps.append(lp)
    return jnp.stack(lps)


# --------------------------------------------------------------------------------------
# main
# --------------------------------------------------------------------------------------

if __name__ == "__main__":
    key = jax.random.PRNGKey(0)
    k_params, k_state, k_action, k_act, k_state2, k_action2 = jax.random.split(key, 6)

    # small shapes implied by the module
    batch = 8
    state_dim = 16
    action_dim = 4
    n_agents = 2
    action_std = 0.5
    actor_layer = [32, 32]
    critic_layer = [32, 32]

    model = ActorCriticPallas(state_dim, action_dim, n_agents, action_std,
                              actor_layer, critic_layer, k_params)

    state = jax.random.normal(k_state, (batch, state_dim), jnp.float32)
    action = jax.random.normal(k_action, (batch, action_dim), jnp.float32)
    agent_idx = 1

    # evaluate() -- fused actor+critic path (single grid tile)
    logp, value, entropy = model.evaluate(state, action, agent_idx)
    jax.block_until_ready((logp, value, entropy))

    ref_logp, ref_value, ref_entropy = _ref_evaluate(model, state, action, agent_idx)
    assert jnp.allclose(logp, ref_logp, atol=1e-4, rtol=1e-4)
    assert jnp.allclose(value, ref_value, atol=1e-4, rtol=1e-4)
    assert jnp.allclose(entropy, ref_entropy, atol=1e-4, rtol=1e-4)

    # evaluate() again on a non-multiple batch to exercise multi-tile + tail padding
    batch2 = 300
    state2 = jax.random.normal(k_state2, (batch2, state_dim), jnp.float32)
    action2 = jax.random.normal(k_action2, (batch2, action_dim), jnp.float32)
    logp2, value2, _ = model.evaluate(state2, action2, 0)
    jax.block_until_ready((logp2, value2))
    ref_logp2, ref_value2, _ = _ref_evaluate(model, state2, action2, 0)
    assert jnp.allclose(logp2, ref_logp2, atol=1e-4, rtol=1e-4)
    assert jnp.allclose(value2, ref_value2, atol=1e-4, rtol=1e-4)

    # act() -- stochastic fused path (one pallas_call, all agents)
    actions, act_logps = model.act(state, k_act)
    jax.block_until_ready((actions, act_logps))

    assert actions.shape == (n_agents, batch, action_dim)
    assert act_logps.shape == (n_agents, batch)
    # sampled actions must equal mean + std * eps for the same key
    eps = jax.random.normal(k_act, (batch, n_agents * action_dim), jnp.float32)
    mean_ref = _ref_mlp(state, model.actor_params, True)
    act_ref = jnp.transpose((mean_ref + action_std * eps)
                            .reshape(batch, n_agents, action_dim), (1, 0, 2))
    assert jnp.allclose(actions, act_ref, atol=1e-4, rtol=1e-4)
    # log_prob of the sampled actions must match the reference Gaussian formula
    ref_act_lps = _ref_act_logprob(model, state, actions)
    assert jnp.allclose(act_logps, ref_act_lps, atol=1e-4, rtol=1e-4)

    print("KERNEL_OK")
</pallas_src>

<mosaic_0001>
module attributes {stable_mosaic.version = 11 : i64} {
  func.func @kernel(%arg0: i32, %arg1: memref<8x20xf32, #tpu.memory_space<vmem>>, %arg2: memref<16x64xf32, #tpu.memory_space<vmem>>, %arg3: memref<1x64xf32, #tpu.memory_space<vmem>>, %arg4: memref<64x64xf32, #tpu.memory_space<vmem>>, %arg5: memref<1x64xf32, #tpu.memory_space<vmem>>, %arg6: memref<64x5xf32, #tpu.memory_space<vmem>>, %arg7: memref<1x5xf32, #tpu.memory_space<vmem>>, %arg8: memref<8x2xf32, #tpu.memory_space<vmem>>) attributes {dimension_semantics = [#tpu.dimension_semantics<parallel>], iteration_bounds = array<i64: 1>, scalar_prefetch = 0 : i64, scratch_operands = 0 : i64, tpu.core_type = #tpu.core_type<tc>, window_params = [{transform_indices = @transform_0, window_bounds = array<i64: 8, 20>}, {pipeline_mode = #tpu.pipeline_mode<synchronous>, transform_indices = @transform_1, window_bounds = array<i64: 16, 64>}, {pipeline_mode = #tpu.pipeline_mode<synchronous>, transform_indices = @transform_2, window_bounds = array<i64: 1, 64>}, {pipeline_mode = #tpu.pipeline_mode<synchronous>, transform_indices = @transform_3, window_bounds = array<i64: 64, 64>}, {pipeline_mode = #tpu.pipeline_mode<synchronous>, transform_indices = @transform_4, window_bounds = array<i64: 1, 64>}, {pipeline_mode = #tpu.pipeline_mode<synchronous>, transform_indices = @transform_5, window_bounds = array<i64: 64, 5>}, {pipeline_mode = #tpu.pipeline_mode<synchronous>, transform_indices = @transform_6, window_bounds = array<i64: 1, 5>}, {transform_indices = @transform_7, window_bounds = array<i64: 8, 2>}]} {
    %c0 = arith.constant 0 : index
    %c0_0 = arith.constant 0 : index
    %0 = vector.load %arg1[%c0, %c0_0] : memref<8x20xf32, #tpu.memory_space<vmem>>, vector<8x20xf32>
    %1 = vector.extract_strided_slice %0 {offsets = [0, 0], sizes = [8, 16], strides = [1, 1]} : vector<8x20xf32> to vector<8x16xf32>
    %2 = vector.extract_strided_slice %0 {offsets = [0, 16], sizes = [8, 4], strides = [1, 1]} : vector<8x20xf32> to vector<8x4xf32>
    %c0_1 = arith.constant 0 : index
    %c0_2 = arith.constant 0 : index
    %3 = vector.load %arg2[%c0_1, %c0_2] : memref<16x64xf32, #tpu.memory_space<vmem>>, vector<16x64xf32>
    %c0_3 = arith.constant 0 : index
    %c0_4 = arith.constant 0 : index
    %4 = vector.load %arg3[%c0_3, %c0_4] : memref<1x64xf32, #tpu.memory_space<vmem>>, vector<1x64xf32>
    %cst = arith.constant dense<0.000000e+00> : vector<8x64xf32>
    %5 = tpu.matmul %1, %3, %cst {dimension_numbers = #tpu.dot_dimension_numbers<[1], [0], [0], [1], [0, 0, 1, 1], [], []>} : vector<8x16xf32>, vector<16x64xf32>, vector<8x64xf32> -> vector<8x64xf32>
    %6 = vector.broadcast %4 : vector<1x64xf32> to vector<8x64xf32>
    %7 = arith.addf %5, %6 : vector<8x64xf32>
    %8 = math.tanh %7 : vector<8x64xf32>
    %c0_5 = arith.constant 0 : index
    %c0_6 = arith.constant 0 : index
    %9 = vector.load %arg4[%c0_5, %c0_6] : memref<64x64xf32, #tpu.memory_space<vmem>>, vector<64x64xf32>
    %c0_7 = arith.constant 0 : index
    %c0_8 = arith.constant 0 : index
    %10 = vector.load %arg5[%c0_7, %c0_8] : memref<1x64xf32, #tpu.memory_space<vmem>>, vector<1x64xf32>
    %cst_9 = arith.constant dense<0.000000e+00> : vector<8x64xf32>
    %11 = tpu.matmul %8, %9, %cst_9 {dimension_numbers = #tpu.dot_dimension_numbers<[1], [0], [0], [1], [0, 0, 1, 1], [], []>} : vector<8x64xf32>, vector<64x64xf32>, vector<8x64xf32> -> vector<8x64xf32>
    %12 = vector.broadcast %10 : vector<1x64xf32> to vector<8x64xf32>
    %13 = arith.addf %11, %12 : vector<8x64xf32>
    %14 = math.tanh %13 : vector<8x64xf32>
    %c0_10 = arith.constant 0 : index
    %c0_11 = arith.constant 0 : index
    %15 = vector.load %arg6[%c0_10, %c0_11] : memref<64x5xf32, #tpu.memory_space<vmem>>, vector<64x5xf32>
    %c0_12 = arith.constant 0 : index
    %c0_13 = arith.constant 0 : index
    %16 = vector.load %arg7[%c0_12, %c0_13] : memref<1x5xf32, #tpu.memory_space<vmem>>, vector<1x5xf32>
    %cst_14 = arith.constant dense<0.000000e+00> : vector<8x5xf32>
    %17 = tpu.matmul %14, %15, %cst_14 {dimension_numbers = #tpu.dot_dimension_numbers<[1], [0], [0], [1], [0, 0, 1, 1], [], []>} : vector<8x64xf32>, vector<64x5xf32>, vector<8x5xf32> -> vector<8x5xf32>
    %18 = vector.broadcast %16 : vector<1x5xf32> to vector<8x5xf32>
    %19 = arith.addf %17, %18 : vector<8x5xf32>
    %20 = vector.extract_strided_slice %19 {offsets = [0, 0], sizes = [8, 4], strides = [1, 1]} : vector<8x5xf32> to vector<8x4xf32>
    %21 = math.tanh %20 : vector<8x4xf32>
    %22 = vector.extract_strided_slice %19 {offsets = [0, 4], sizes = [8, 1], strides = [1, 1]} : vector<8x5xf32> to vector<8x1xf32>
    %23 = arith.subf %2, %21 : vector<8x4xf32>
    %24 = arith.mulf %23, %23 : vector<8x4xf32>
    %cst_15 = arith.constant dense<0.000000e+00> : vector<8xf32>
    %25 = vector.multi_reduction <add>, %24, %cst_15 [1] : vector<8x4xf32> to vector<8xf32>
    %26 = vector.shape_cast %25 : vector<8xf32> to vector<8x1xf32>
    %cst_16 = arith.constant -2.000000e+00 : f32
    %27 = vector.broadcast %cst_16 : f32 to vector<8x1xf32>
    %28 = arith.mulf %27, %26 : vector<8x1xf32>
    %cst_17 = arith.constant -0.9031654 : f32
    %29 = vector.broadcast %cst_17 : f32 to vector<8x1xf32>
    %30 = arith.addf %28, %29 : vector<8x1xf32>
    %31 = tpu.concatenate %30, %22 in 1 : vector<8x1xf32>, vector<8x1xf32> -> vector<8x2xf32>
    %c0_18 = arith.constant 0 : index
    %c0_19 = arith.constant 0 : index
    %32 = vector.load %arg8[%c0_18, %c0_19] : memref<8x2xf32, #tpu.memory_space<vmem>>, vector<8x2xf32>
    tpu.vector_store %arg8[%c0_18, %c0_19], %31 {strides = array<i32>} : memref<8x2xf32, #tpu.memory_space<vmem>>, vector<8x2xf32>,
    return
  }
  func.func @transform_0(%arg0: i32) -> (i32, i32) {
    %c0_i32 = arith.constant 0 : i32
    %c0_i32_0 = arith.constant 0 : i32
    return %arg0, %c0_i32 : i32, i32
  }
  func.func @transform_1(%arg0: i32) -> (i32, i32) {
    %c0_i32 = arith.constant 0 : i32
    %c0_i32_0 = arith.constant 0 : i32
    %c0_i32_1 = arith.constant 0 : i32
    return %c0_i32, %c0_i32_0 : i32, i32
  }
  func.func @transform_2(%arg0: i32) -> (i32, i32) {
    %c0_i32 = arith.constant 0 : i32
    %c0_i32_0 = arith.constant 0 : i32
    %c0_i32_1 = arith.constant 0 : i32
    return %c0_i32, %c0_i32_0 : i32, i32
  }
  func.func @transform_3(%arg0: i32) -> (i32, i32) {
    %c0_i32 = arith.constant 0 : i32
    %c0_i32_0 = arith.constant 0 : i32
    %c0_i32_1 = arith.constant 0 : i32
    return %c0_i32, %c0_i32_0 : i32, i32
  }
  func.func @transform_4(%arg0: i32) -> (i32, i32) {
    %c0_i32 = arith.constant 0 : i32
    %c0_i32_0 = arith.constant 0 : i32
    %c0_i32_1 = arith.constant 0 : i32
    return %c0_i32, %c0_i32_0 : i32, i32
  }
  func.func @transform_5(%arg0: i32) -> (i32, i32) {
    %c0_i32 = arith.constant 0 : i32
    %c0_i32_0 = arith.constant 0 : i32
    %c0_i32_1 = arith.constant 0 : i32
    return %c0_i32, %c0_i32_0 : i32, i32
  }
  func.func @transform_6(%arg0: i32) -> (i32, i32) {
    %c0_i32 = arith.constant 0 : i32
    %c0_i32_0 = arith.constant 0 : i32
    %c0_i32_1 = arith.constant 0 : i32
    return %c0_i32, %c0_i32_0 : i32, i32
  }
  func.func @transform_7(%arg0: i32) -> (i32, i32) {
    %c0_i32 = arith.constant 0 : i32
    %c0_i32_0 = arith.constant 0 : i32
    return %arg0, %c0_i32 : i32, i32
  }
}

</mosaic_0001>

<bundles_post_ra>
// kernel: tpu_custom_call.1
= control target key start
LH: loop header
LB: loop body
LE: loop exit
PB: predicated region body
PF: predicated region fallthrough
CT: control target
= control target key end

     0   :  { %12 = vsyncpa [#allocation3], 0  ;;  %s619_s0 = inlined_call_operand.vmem [shape: f32[8,20], index: 0, kind: input, shape index: {}]   ;;  %s620_s1 = inlined_call_operand.hbm [shape: f32[16,64], index: 1, kind: input, shape index: {}]   ;;  %s621_s2 = inlined_call_operand.vmem [shape: f32[1,64], index: 2, kind: input, shape index: {}]   ;;  %s622_s3 = inlined_call_operand.vmem [shape: f32[64,64], index: 3, kind: input, shape index: {}]   ;;  %s623_s4 = inlined_call_operand.hbm [shape: f32[1,64], index: 4, kind: input, shape index: {}]   ;;  %s624_s5 = inlined_call_operand.vmem [shape: f32[64,5], index: 5, kind: input, shape index: {}]   ;;  %s625_s6 = inlined_call_operand.vmem [shape: f32[1,5], index: 6, kind: input, shape index: {}]   ;;  %s626_s7 = inlined_call_operand.vmem [shape: f32[8,2], index: 7, kind: output, shape index: {}]  }
   0x1   :  { %13 = vsyncpa [#allocation5], 0  ;;  %s477_s24 = smov [#allocation2]  }
   0x2   :  { %s21_s25 = sshll.u32 %s477_s24, 4  ;;  %s22_s25 = int_to_ptr.vmem [resolvable:$true] %s21_s25 }
   0x3   :  { %s441_s26 = scalar_lea.vmem %s22_s25, 256  ;;  %p446_p1 = scmp.lt.s32.totalorder %s22_s25, %s22_s25 }
   0x4   :  { %p442_p0 = scmp.ne.s32.totalorder %s22_s25, %s441_s26  ;;  %p447_p2 = scmp.lt.s32.totalorder %s441_s26, %s441_s26 }
   0x6   :  { %p448_p3 = por %p447_p2, %p446_p1 }
   0x8   :  { %p449_p4 = pnand %p448_p3, %p442_p0 }
   0xa   :  { %452 = shalt.err (!%p449_p4)
}
   0xb   :  { %s478_s27 = smov 128   ;;  %s479_s28 = smov 8  }
   0xc   :  { %27 = dma.hbm_to_vmem [thread:$0]  %s620_s1, 256, %s22_s25, [#allocation3], %s478_s27, %s478_s27, %s479_s28  }
   0xd   :  { %s480_s8 = smov [#allocation4]  }
   0xe   :  { %s38_s9 = sshll.u32 %s480_s8, 4  ;;  %s39_s9 = int_to_ptr.vmem [resolvable:$true] %s38_s9 }
   0xf   :  { %s461_s10 = scalar_lea.vmem %s39_s9, 16  ;;  %s465_s11 = scalar_lea.vmem %s39_s9, 32 }
  0x10   :  { %p462_p5 = scmp.ne.s32.totalorder %s39_s9, %s461_s10  ;;  %p466_p6 = scmp.lt.s32.totalorder %s39_s9, %s39_s9 }
  0x11   :  { %p467_p7 = scmp.lt.s32.totalorder %s465_s11, %s461_s10 }
  0x13   :  { %p468_p8 = por %p467_p7, %p466_p6 }
  0x15   :  { %p469_p9 = pnand %p468_p8, %p462_p5 }
  0x17   :  { %472 = shalt.err (!%p469_p9)
}
  0x18   :  { %41 = dma.hbm_to_vmem [thread:$0]  %s623_s4, 16, %s39_s9, [#allocation5]  }
  0x19   :  { %473 = dma.done.wait [#allocation3], 256  }
  0x1a   :  { %474 = vsyncadd [#allocation3], 4294967040 }
  0x1b   :  { %475 = dma.done.wait [#allocation5], 16  }
  0x1c   :  { %476 = vsyncadd [#allocation5], 4294967280  ;;  %v481_v0 = vmov 0.0   ;;  %vm482_vm0 = vmmov 0   ;;  %v54_v1 = vld [vmem:[#allocation2 + $0x8] sm:$0xff]  ;;  %v53_v2 = vld [vmem:[#allocation2] sm:$0xff] }
  0x1d   :  { %373 = vmatprep.subr.mxu0 %v481_v0  ;;  %377 = vmatprep.mubr.msk.f32.mxu0 %vm482_vm0, %v481_v0  ;;  %v539_v3 = vld [vmem:[%s619_s0] sm:$0xff]  ;;  %vm62_vm1 = vcmask 130048   ;;  %v144_v4 = vld [vmem:[%s622_s3 + $0x38] sm:$0xff]  ;;  %v143_v5 = vld [vmem:[%s622_s3 + $0x30] sm:$0xff]  ;;  %vm152_vm2 = vcmask 523264   ;;  %s484_s21 = smov 112  }
  0x1e   :  { %380 = vmatprep.subr.mxu1 %v481_v0  ;;  %396 = vmatprep.mubr.msk.f32.mxu1 %vm482_vm0, %v481_v0  ;;  %v142_v6 = vld [vmem:[%s622_s3 + $0x28] sm:$0xff]  ;;  %v141_v7 = vld [vmem:[%s622_s3 + $0x20] sm:$0xff]  ;;  %v140_v8 = vld [vmem:[%s622_s3 + $0x18] sm:$0xff]  ;;  %vm326_vm3 = vcmask 31744   ;;  %s485_s22 = smov 125   ;;  %vm336_vm4 = vcmask 7168  }
  0x1f   :  { %374 = vmatpush3.msra.mxu0 %v54_v1  ;;  %381 = vmatpush3.msra.mxu1 %v144_v4  ;;  %v139_v9 = vld [vmem:[%s622_s3 + $0x10] sm:$0xff]  ;;  %v138_v10 = vld [vmem:[%s622_s3 + $0x8] sm:$0xff]  ;;  %v137_v11 = vld [vmem:[%s622_s3] sm:$0xff]  ;;  %vm338_vm5 = vcmask 15360  }
  0x20   :  { %375 = vmatprep.subr.mxu0 %v481_v0  ;;  %382 = vmatprep.subr.mxu1 %v481_v0  ;;  %v346_v12 = vld [vmem:[%s621_s2] ss:$0 sm:$0xff]  ;;  %v234_v17 = vld [vmem:[%s624_s5 + $0x38] sm:$0xff]  ;;  %v233_v18 = vld [vmem:[%s624_s5 + $0x30] sm:$0xff] }
  0x21   :  { %376 = vmatpush3.msra.mxu0 %v53_v2  ;;  %383 = vmatpush3.msra.mxu1 %v143_v5  ;;  %v232_v19 = vld [vmem:[%s624_s5 + $0x28] sm:$0xff]  ;;  %v231_v20 = vld [vmem:[%s624_s5 + $0x20] sm:$0xff]  ;;  %v230_v21 = vld [vmem:[%s624_s5 + $0x18] sm:$0xff] }
  0x22   :  { %378 = vmatmul.mubr.msk.f32.vlgmr.msra.gmra.mxu0 %vm62_vm1, %v539_v3  ;;  %399 = vmatprep.subr.mxu0 %v481_v0  ;;  %v229_v22 = vld [vmem:[%s624_s5 + $0x10] sm:$0xff]  ;;  %v228_v23 = vld [vmem:[%s624_s5 + $0x8] sm:$0xff]  ;;  %v227_v24 = vld [vmem:[%s624_s5] sm:$0xff]  ;;  %s483_s5 = smov 16  }
  0x23   :  { %415 = vmatprep.mubr.msk.f32.mxu0 %vm482_vm0, %v481_v0  ;;  %384 = vmatprep.subr.mxu1 %v481_v0  ;;  %v348_v25 = vld [vmem:[#allocation4] ss:$0 sm:$0xff]  ;;  %v350_v30 = vld [vmem:[%s625_s6] ss:$0 sm:$0xff] }
  0x24   :  { %385 = vmatpush3.msra.mxu1 %v142_v6  ;;  %400 = vmatpush3.msra.mxu0 %v234_v17 }
  0x25   :  { %386 = vmatprep.subr.mxu1 %v481_v0  ;;  %401 = vmatprep.subr.mxu0 %v481_v0 }
  0x26   :  { %387 = vmatpush3.msra.mxu1 %v141_v7  ;;  %402 = vmatpush3.msra.mxu0 %v233_v18 }
  0x27   :  { %388 = vmatprep.subr.mxu1 %v481_v0  ;;  %403 = vmatprep.subr.mxu0 %v481_v0 }
  0x28   :  { %389 = vmatpush3.msra.mxu1 %v140_v8  ;;  %404 = vmatpush3.msra.mxu0 %v232_v19 }
  0x29   :  { %390 = vmatprep.subr.mxu1 %v481_v0  ;;  %405 = vmatprep.subr.mxu0 %v481_v0 }
  0x2a   :  { %391 = vmatpush3.msra.mxu1 %v139_v9  ;;  %406 = vmatpush3.msra.mxu0 %v231_v20 }
  0x2b   :  { %392 = vmatprep.subr.mxu1 %v481_v0  ;;  %407 = vmatprep.subr.mxu0 %v481_v0 }
  0x2c   :  { %393 = vmatpush3.msra.mxu1 %v138_v10  ;;  %408 = vmatpush3.msra.mxu0 %v230_v21 }
  0x2d   :  { %394 = vmatprep.subr.mxu1 %v481_v0  ;;  %409 = vmatprep.subr.mxu0 %v481_v0 }
  0x2e   :  { %395 = vmatpush3.msra.mxu1 %v137_v11  ;;  %410 = vmatpush3.msra.mxu0 %v229_v22 }
  0x2f   :  { %411 = vmatprep.subr.mxu0 %v481_v0 }
  0x30   :  { %412 = vmatpush3.msra.mxu0 %v228_v23 }
  0x31   :  { %413 = vmatprep.subr.mxu0 %v481_v0 }
  0x32   :  { %414 = vmatpush3.msra.mxu0 %v227_v24 }
  0xe2   :  { %v132_v13 = vpop.f32.mrf.mxu0 }
  0xe3   :  { %v133_v14 = vadd.f32 %v346_v12, %v132_v13 }
  0xe4   :  { %v379_v15 = vpop.f32.mrf.mxu0 }
  0xe5   :  { %427 = vtanh.f32 %v133_v14 }
  0xf2   :  { %v428_v16 = vpop.eup %427 }
  0xf3   :  { %397 = vmatmul.mubr.msk.f32.vlgmr.msra.gmra.mxu1 %vm152_vm2, %v428_v16 }
 0x1b3   :  { %v222_v26 = vpop.f32.mrf.mxu1 }
 0x1b4   :  { %v223_v27 = vadd.f32 %v348_v25, %v222_v26 }
 0x1b5   :  { %v398_v28 = vpop.f32.mrf.mxu1 }
 0x1b6   :  { %429 = vtanh.f32 %v223_v27 }
 0x1c3   :  { %v430_v29 = vpop.eup %429 }
 0x1c4   :  { %416 = vmatmul.mubr.msk.f32.vlgmr.msra.gmra.mxu0 %vm152_vm2, %v430_v29 }
 0x284   :  { %v311_v31 = vpop.f32.mrf.mxu0 }
 0x285   :  { %v312_v32 = vadd.f32 %v350_v30, %v311_v31 }
 0x286   :  { %v417_v33 = vpop.f32.mrf.mxu0 }
 0x287   :  { %431 = vtanh.f32 %v312_v32 }
 0x294   :  { %v432_v34 = vpop.eup %431 }
 0x295   :  { %317 = vrot.lane.b32.xlu0 %v432_v34, %s483_s5 }
 0x307   :  { %v318_v35 = vpop.permute.xlu0 %317 }
 0x308   :  { %v320_v36 = vsub.f32 %v539_v3, %v318_v35 }
 0x30a   :  { %v321_v37 = vmul.f32 %v320_v36, %v320_v36 }
 0x30c   :  { %323 = vrot.lane.b32.xlu0 %v321_v37, %s484_s21 }
 0x37e   :  { %v324_v38 = vpop.permute.xlu0 %323 }
 0x37f   :  { %v327_v39 = vsel %vm326_vm3, %v324_v38, 0.0 }
 0x380   :  { %328 = vadd.xlane.f32.xlu1 %v327_v39 }
 0x391   :  { %333 = vrot.lane.b32.xlu1 %v312_v32, %s485_s22 }
 0x409   :  { %v329_v40 = vpop.xlane.xlu1 %328 }
 0x40a   :  { %v330_v41 = vmul.f32 -2.0, %v329_v40 }
 0x40c   :  { %v331_v42 = vadd.f32 -0.9031654, %v330_v41 }
 0x40d   :  { %v334_v43 = vpop.permute.xlu1 %333 }
 0x40e   :  { %v337_v44 = vsel %vm336_vm4, %v331_v42, %v334_v43 }
 0x40f   :  { %339 = vst.msk [vmem:[%s626_s7] sm:$0xff] %vm338_vm5, %v337_v44 }
 0x410   :  { %344 = vsyncpa [#allocation3], 1 }
 0x411   :  { %345 = vsyncpa [#allocation5], 1 }

</bundles_post_ra>
